<compile_context>
chip_gen: v7x
topology: tpu7x:2x2x1
jax: 0.10.0
libtpu: 0.0.40
codegen_flags: <defaults>
</compile_context>

<pallas_src>
import numpy as np

import jax
import jax.numpy as jnp
from jax.experimental import pallas as pl
from jax.experimental.pallas import tpu as pltpu


def _round_up(x, m):
    return ((x + m - 1) // m) * m


# ----------------------------------------------------------------------------
# Kernel 1: mel spectrogram fused with the mel L1 reduction
# ----------------------------------------------------------------------------
def _mel_l1_kernel(frames_ref, dftw_ref, fb_ref, tgt_ref, o_ref):
    @pl.when(pl.program_id(1) == 0)
    def _():
        o_ref[...] = jnp.zeros_like(o_ref)

    # Windowed DFT (window folded into dftw): one (TM, n_fft) x (n_fft, 2*f_pad) matmul.
    spec = jnp.dot(frames_ref[...], dftw_ref[...], preferred_element_type=jnp.float32)
    # Power + mel filterbank (fb duplicated over re/im halves): (TM, 2*f_pad) x (2*f_pad, 128).
    mel = jnp.dot(spec * spec, fb_ref[...], preferred_element_type=jnp.float32)
    nm = tgt_ref.shape[-1]
    # Only the first n_mels columns of `mel` are real data; target is streamed narrow.
    part = jnp.sum(jnp.abs(mel[:, :nm] - tgt_ref[...]))
    o_ref[...] = o_ref[...] + part


def _mel_filterbank(n_freq, n_mels, sample_rate, n_fft):
    def hz2mel(f):
        return 2595.0 * np.log10(1.0 + f / 700.0)

    def mel2hz(m):
        return 700.0 * (10.0 ** (m / 2595.0) - 1.0)

    mel_pts = np.linspace(hz2mel(0.0), hz2mel(sample_rate / 2.0), n_mels + 2)
    hz_pts = mel2hz(mel_pts)
    bins = np.floor((n_fft + 1) * hz_pts / sample_rate).astype(np.int64)
    fb = np.zeros((n_freq, n_mels), dtype=np.float32)
    for m in range(1, n_mels + 1):
        l, c, r = bins[m - 1], bins[m], bins[m + 1]
        for k in range(l, c):
            if c > l:
                fb[k, m - 1] = (k - l) / float(c - l)
        for k in range(c, min(r, n_freq)):
            if r > c:
                fb[k, m - 1] = (r - k) / float(r - c)
    return fb


class MelSpectrogramPallas:
    # TODO(synk): original MelSpectrogram config/class is not provided; this is a
    # deterministic simplified power-mel (Hann window, center=False, power=2.0, hop==n_fft,
    # HTK-style filterbank without norm).
    def __init__(self, sample_rate=16000, n_fft=64, hop_length=64, n_mels=8):
        assert hop_length == n_fft, "hop == n_fft assumed so framing is a free reshape"
        self.n_fft = n_fft
        self.hop = hop_length
        self.n_mels = n_mels
        self.n_freq = n_fft // 2 + 1
        self.f_pad = _round_up(self.n_freq, 64)            # 2*f_pad is a multiple of 128
        self.nm_pad = 128                                   # matmul output lane width

        n = np.arange(n_fft, dtype=np.float64)
        k = np.arange(self.n_freq, dtype=np.float64)
        ang = 2.0 * np.pi * np.outer(n, k) / n_fft          # (n_fft, n_freq)
        win = 0.5 - 0.5 * np.cos(2.0 * np.pi * n / n_fft)   # Hann (periodic)

        # Kept for the pure-JAX reference.
        self.win_np = win.astype(np.float32)[None, :]
        self.cos_np = np.cos(ang).astype(np.float32)
        self.sin_np = (-np.sin(ang)).astype(np.float32)
        self.fb_np = _mel_filterbank(self.n_freq, n_mels, sample_rate, n_fft)

        # Fused, windowed [cos | -sin] DFT operand, lane-padded to 2*f_pad columns.
        dftw = np.zeros((n_fft, 2 * self.f_pad), np.float64)
        dftw[:, :self.n_freq] = np.cos(ang)
        dftw[:, self.f_pad:self.f_pad + self.n_freq] = -np.sin(ang)
        dftw *= win[:, None]
        self.dftw_np = dftw.astype(np.float32)

        # Mel filterbank duplicated over the re/im halves (lane-padded matmul output; the
        # padded columns are sliced off in-kernel and cost nothing extra on the MXU).
        fb2 = np.zeros((2 * self.f_pad, self.nm_pad), np.float32)
        fb2[:self.n_freq, :n_mels] = self.fb_np
        fb2[self.f_pad:self.f_pad + self.n_freq, :n_mels] = self.fb_np
        self.fb2_np = fb2

    def n_frames(self, T):
        return (T - self.n_fft) // self.hop + 1

    def l1_abs_sum(self, audio, target_bmf):
        """Returns sum(|mel(audio) - target|); target_bmf is (B, n_mels, n_frames)."""
        B, T = audio.shape
        nf = self.n_frames(T)
        usable = nf * self.n_fft
        M = B * nf
        # hop == n_fft -> framing is a contiguous (bitcast) reshape, no gather / data copy.
        frames = audio[:, :usable].reshape(M, self.n_fft).astype(jnp.float32)
        # Target rearranged frame-major to align with `frames` rows (tiny tensor, kept narrow).
        tgt = target_bmf.astype(jnp.float32).transpose(0, 2, 1).reshape(M, self.n_mels)

        # Large frame tiles amortize the ~0.35us per-step cost; the leading size-2 "parallel"
        # axis shards rows across both TensorCores on v7x (harmless loop on v5e/v6e).
        half = _round_up(max((M + 1) // 2, 1), 8)
        tile_m = min(2048, half)
        n_inner = -(-half // tile_m)
        m_pad = 2 * n_inner * tile_m
        if m_pad > M:
            frames = jnp.pad(frames, ((0, m_pad - M), (0, 0)))
            tgt = jnp.pad(tgt, ((0, m_pad - M), (0, 0)))     # zero rows contribute |0-0| = 0

        two_f = 2 * self.f_pad
        out = pl.pallas_call(
            _mel_l1_kernel,
            grid=(2, n_inner),
            in_specs=[
                pl.BlockSpec((tile_m, self.n_fft), lambda c, i, ni=n_inner: (c * ni + i, 0)),
                pl.BlockSpec((self.n_fft, two_f), lambda c, i: (0, 0)),
                pl.BlockSpec((two_f, self.nm_pad), lambda c, i: (0, 0)),
                pl.BlockSpec((tile_m, self.n_mels), lambda c, i, ni=n_inner: (c * ni + i, 0)),
            ],
            out_specs=pl.BlockSpec((1, 128), lambda c, i: (0, c)),
            out_shape=jax.ShapeDtypeStruct((1, 256), jnp.float32),
            compiler_params=pltpu.CompilerParams(
                dimension_semantics=("parallel", "arbitrary"),
                vmem_limit_bytes=32 * 1024 * 1024),
        )(frames, jnp.asarray(self.dftw_np), jnp.asarray(self.fb2_np), tgt)
        # One accumulator lane-block per core; combine them here.
        return out[0, 0] + out[0, 128]


# ----------------------------------------------------------------------------
# Kernel 2: all adversarial reductions + all feature-matching L1 terms, one launch
# ----------------------------------------------------------------------------
def _make_adv_fm_kernel(n_real, n_gen, pair_weights):
    n_pairs = len(pair_weights)

    def kernel(*refs):
        real_refs = refs[:n_real]
        gen_refs = refs[n_real:n_real + n_gen]
        pair_refs = refs[n_real + n_gen:n_real + n_gen + 2 * n_pairs]
        dadv_ref, gadv_ref, fm_ref = refs[n_real + n_gen + 2 * n_pairs:]

        dadv = jnp.zeros(dadv_ref.shape, jnp.float32)
        gadv = jnp.zeros(gadv_ref.shape, jnp.float32)
        for r in real_refs:                                   # DAdv real branch
            x = r[...]
            d = x - 1.0
            dadv = dadv + jnp.mean(d * d, axis=-1, keepdims=True)
        for g in gen_refs:                                    # DAdv gen branch + GAdv
            x = g[...]
            dadv = dadv + jnp.mean(x * x, axis=-1, keepdims=True)
            d = x - 1.0
            gadv = gadv + jnp.mean(d * d, axis=-1, keepdims=True)

        fm = jnp.zeros(fm_ref.shape, jnp.float32)
        for p, w in enumerate(pair_weights):                  # w = fm_scale / N  (constant)
            a = pair_refs[2 * p][...]
            b = pair_refs[2 * p + 1][...]
            fm = fm + w * jnp.sum(jnp.abs(a - b))

        dadv_ref[...] = dadv
        gadv_ref[...] = gadv
        fm_ref[...] = fm

    return kernel


def fused_adv_fm(real_list, gen_list, fm_pairs, fm_scale, batch):
    """One pallas_call for DAdv + GAdv over every discriminator head and every FM L1 pair.
       Operands stay in their original layout (no pad/concat glue, no weight operand)."""
    reals = []
    for x in real_list:
        assert x.ndim == 2 and x.shape[0] == batch
        reals.append(x.astype(jnp.float32))
    gens = []
    for x in gen_list:
        assert x.ndim == 2 and x.shape[0] == batch
        gens.append(x.astype(jnp.float32))

    pair_ops, weights = [], []
    for a, b in fm_pairs:
        # torch F.l1_loss broadcasts mismatched shapes (with a warning) -> reproduce.
        a, b = jnp.broadcast_arrays(a.astype(jnp.float32), b.astype(jnp.float32))
        n = int(np.prod(a.shape))
        # Collapse leading dims (contiguous -> free bitcast reshape); keep the lane dim.
        pair_ops += [a.reshape(-1, a.shape[-1]), b.reshape(-1, b.shape[-1])]
        weights.append(float(fm_scale) / float(n))

    kernel = _make_adv_fm_kernel(len(reals), len(gens), weights)
    out_shapes = (jax.ShapeDtypeStruct((batch, 1), jnp.float32),   # dadv per batch
                  jax.ShapeDtypeStruct((batch, 1), jnp.float32),   # gadv per batch
                  jax.ShapeDtypeStruct((1, 1), jnp.float32))       # fm scalar
    # TODO(synk): whole tensors are kept VMEM-resident (fine at loss-head sizes); very large
    # feature maps would need a tiled / manually-DMA'd (memory_space=pl.ANY) variant.
    dadv, gadv_b, fm = pl.pallas_call(kernel, out_shape=out_shapes)(*reals, *gens, *pair_ops)
    return dadv[:, 0], jnp.sum(gadv_b), fm[0, 0]


# ----------------------------------------------------------------------------
# GANLoss wrapper
# ----------------------------------------------------------------------------
class GANLossPallas:
    def __init__(self, mel_scale, fm_scale):
        self.mel_scale = float(mel_scale)
        self.fm_scale = float(fm_scale)
        self.mel = MelSpectrogramPallas()

    def __call__(self, spectrogram, gen_audio,
                 period_generated, period_feature_generated,
                 period_real, period_feature_real,
                 scale_generated, scale_feature_generated,
                 scale_real, scale_feature_real):
        audio = jnp.squeeze(gen_audio, axis=1)
        B, T = audio.shape
        n_frames = self.mel.n_frames(T)

        # torch: nn.ConstantPad3d((0,0,0,0,0,diff)) pads/crops dim -3 (batch here) at the back.
        diff = n_frames - spectrogram.shape[-1]
        if diff >= 0:
            spec = jnp.pad(spectrogram, ((0, diff), (0, 0), (0, 0)))
        else:
            spec = spectrogram[: spectrogram.shape[0] + diff]
        # TODO(synk): F.l1_loss broadcasting is only reproduced when the padded target
        # broadcasts to the generated mel's (B, n_mels, n_frames) shape (true when diff == 0).
        target = jnp.broadcast_to(spec, (B, self.mel.n_mels, n_frames))

        # Kernel 1: mel spectrogram + mel L1 reduction fused (no mel output HBM round trip).
        mel_abs = self.mel.l1_abs_sum(audio, target)
        mel_loss = self.mel_scale * mel_abs / float(B * self.mel.n_mels * n_frames)

        # Kernel 2: every adversarial reduction + every FM L1 term in a single launch.
        preds = list(period_feature_real) + list(scale_feature_real)
        gens = list(period_feature_generated) + list(scale_feature_generated)
        dadv_loss, gadv_loss, fm_loss = fused_adv_fm(
            real_list=list(period_real) + list(scale_real),
            gen_list=list(period_generated) + list(scale_generated),
            fm_pairs=list(zip(gens, preds)),
            fm_scale=self.fm_scale, batch=B)

        generator_loss = gadv_loss + fm_loss + mel_loss
        descriminator_loss = dadv_loss
        return generator_loss, descriminator_loss, gadv_loss, fm_loss, mel_loss


# ----------------------------------------------------------------------------
# Pure-JAX reference (for correctness check)
# ----------------------------------------------------------------------------
def reference_forward(loss_mod, spectrogram, gen_audio,
                      period_generated, period_feature_generated,
                      period_real, period_feature_real,
                      scale_generated, scale_feature_generated,
                      scale_real, scale_feature_real):
    mel = loss_mod.mel
    audio = jnp.squeeze(gen_audio, axis=1)
    B, T = audio.shape
    n_frames = mel.n_frames(T)
    idx = (np.arange(n_frames)[:, None] * mel.hop + np.arange(mel.n_fft)[None, :])
    frames = audio[:, idx].reshape(B * n_frames, mel.n_fft) * jnp.asarray(mel.win_np)
    hp = jax.lax.Precision.HIGHEST
    re = jnp.dot(frames, jnp.asarray(mel.cos_np), precision=hp)
    im = jnp.dot(frames, jnp.asarray(mel.sin_np), precision=hp)
    gen_spec = jnp.dot(re * re + im * im, jnp.asarray(mel.fb_np), precision=hp)
    gen_spec = gen_spec.reshape(B, n_frames, mel.n_mels).transpose(0, 2, 1)

    diff = gen_spec.shape[-1] - spectrogram.shape[-1]
    spec = jnp.pad(spectrogram, ((0, max(diff, 0)), (0, 0), (0, 0)))

    def gadv(outs):
        return jnp.sum(sum(jnp.mean((o - 1.0) ** 2, axis=-1) for o in outs))

    def dadv(t_out, g_out):
        return (sum(jnp.mean((o - 1.0) ** 2, axis=-1) for o in t_out) +
                sum(jnp.mean(o ** 2, axis=-1) for o in g_out))

    def fm(t_f, g_f):
        return loss_mod.fm_scale * sum(jnp.mean(jnp.abs(g - p)) for p, g in zip(t_f, g_f))

    gadv_loss = gadv(period_generated) + gadv(scale_generated)
    dadv_loss = dadv(period_real, period_generated) + dadv(scale_real, scale_generated)
    fm_loss = (fm(period_feature_real, period_feature_generated) +
               fm(scale_feature_real, scale_feature_generated))
    mel_loss = loss_mod.mel_scale * jnp.mean(jnp.abs(spec - gen_spec))
    return gadv_loss + fm_loss + mel_loss, dadv_loss, gadv_loss, fm_loss, mel_loss


# ----------------------------------------------------------------------------
if __name__ == "__main__":
    key = jax.random.PRNGKey(0)
    ks = jax.random.split(key, 20)

    B, T = 2, 512
    mel_scale, fm_scale = 45.0, 2.0

    gen_audio = jax.random.normal(ks[0], (B, 1, T), jnp.float32)
    # spectrogram with the same number of frames as the synthetic mel (diff == 0)
    spectrogram = jax.random.normal(ks[1], (B, 8, 8), jnp.float32)

    period_generated = [jax.random.normal(ks[2], (B, 32), jnp.float32),
                        jax.random.normal(ks[3], (B, 48), jnp.float32)]
    period_real = [jax.random.normal(ks[4], (B, 32), jnp.float32),
                   jax.random.normal(ks[5], (B, 48), jnp.float32)]
    scale_generated = [jax.random.normal(ks[6], (B, 40), jnp.float32),
                       jax.random.normal(ks[7], (B, 24), jnp.float32)]
    scale_real = [jax.random.normal(ks[8], (B, 40), jnp.float32),
                  jax.random.normal(ks[9], (B, 24), jnp.float32)]

    period_feature_generated = [jax.random.normal(ks[10], (B, 4, 16), jnp.float32),
                                jax.random.normal(ks[11], (B, 8, 8), jnp.float32),
                                jax.random.normal(ks[12], (B, 4, 32), jnp.float32)]
    period_feature_real = [jax.random.normal(ks[13], (B, 4, 16), jnp.float32),
                           jax.random.normal(ks[14], (B, 8, 8), jnp.float32),
                           jax.random.normal(ks[15], (B, 4, 32), jnp.float32)]
    scale_feature_generated = [jax.random.normal(ks[16], (B, 4, 16), jnp.float32),
                               jax.random.normal(ks[17], (B, 8, 16), jnp.float32)]
    scale_feature_real = [jax.random.normal(ks[18], (B, 4, 16), jnp.float32),
                          jax.random.normal(ks[19], (B, 8, 16), jnp.float32)]

    gan_loss = GANLossPallas(mel_scale=mel_scale, fm_scale=fm_scale)

    args = (spectrogram, gen_audio,
            period_generated, period_feature_generated,
            period_real, period_feature_real,
            scale_generated, scale_feature_generated,
            scale_real, scale_feature_real)

    out = gan_loss(*args)
    out = jax.block_until_ready(out)
    gen_l, disc_l, gadv_l, fm_l, mel_l = out

    ref = reference_forward(gan_loss, *args)
    np.testing.assert_allclose(np.asarray(gen_l), np.asarray(ref[0]), rtol=5e-3, atol=1e-2)
    np.testing.assert_allclose(np.asarray(disc_l), np.asarray(ref[1]), rtol=5e-3, atol=1e-2)
    np.testing.assert_allclose(np.asarray(gadv_l), np.asarray(ref[2]), rtol=5e-3, atol=1e-2)
    np.testing.assert_allclose(np.asarray(fm_l), np.asarray(ref[3]), rtol=5e-3, atol=1e-2)
    np.testing.assert_allclose(np.asarray(mel_l), np.asarray(ref[4]), rtol=5e-3, atol=1e-2)

    assert gen_l.shape == () and disc_l.shape == (B,)
    print("KERNEL_OK")
</pallas_src>

<mosaic_0001>
module attributes {stable_mosaic.version = 11 : i64} {
  func.func @_mel_l1_kernel(%arg0: i32, %arg1: i32, %arg2: memref<8x64xf32, #tpu.memory_space<vmem>>, %arg3: memref<64x128xf32, #tpu.memory_space<vmem>>, %arg4: memref<128x128xf32, #tpu.memory_space<vmem>>, %arg5: memref<8x8xf32, #tpu.memory_space<vmem>>, %arg6: memref<1x128xf32, #tpu.memory_space<vmem>>) attributes {dimension_semantics = [#tpu.dimension_semantics<parallel>, #tpu.dimension_semantics<arbitrary>], iteration_bounds = array<i64: 2, 1>, scalar_prefetch = 0 : i64, scratch_operands = 0 : i64, tpu.core_type = #tpu.core_type<tc>, window_params = [{transform_indices = @transform_0, window_bounds = array<i64: 8, 64>}, {pipeline_mode = #tpu.pipeline_mode<synchronous>, transform_indices = @transform_1, window_bounds = array<i64: 64, 128>}, {pipeline_mode = #tpu.pipeline_mode<synchronous>, transform_indices = @transform_2, window_bounds = array<i64: 128, 128>}, {transform_indices = @transform_3, window_bounds = array<i64: 8, 8>}, {transform_indices = @transform_4, window_bounds = array<i64: 1, 128>}]} {
    %c0_i32 = arith.constant 0 : i32
    %0 = arith.cmpi eq, %arg1, %c0_i32 : i32
    %1 = arith.extui %0 : i1 to i32
    %c0_i32_0 = arith.constant 0 : i32
    %2 = arith.cmpi ne, %1, %c0_i32_0 : i32
    scf.if %2 {
      %cst_14 = arith.constant 0.000000e+00 : f32
      %21 = vector.broadcast %cst_14 : f32 to vector<1x128xf32>
      %c0_15 = arith.constant 0 : index
      %c0_16 = arith.constant 0 : index
      %22 = vector.load %arg6[%c0_15, %c0_16] : memref<1x128xf32, #tpu.memory_space<vmem>>, vector<1x128xf32>
      tpu.vector_store %arg6[%c0_15, %c0_16], %21 {strides = array<i32>} : memref<1x128xf32, #tpu.memory_space<vmem>>, vector<1x128xf32>,
    } else {
    }
    %c0 = arith.constant 0 : index
    %c0_1 = arith.constant 0 : index
    %3 = vector.load %arg2[%c0, %c0_1] : memref<8x64xf32, #tpu.memory_space<vmem>>, vector<8x64xf32>
    %c0_2 = arith.constant 0 : index
    %c0_3 = arith.constant 0 : index
    %4 = vector.load %arg3[%c0_2, %c0_3] : memref<64x128xf32, #tpu.memory_space<vmem>>, vector<64x128xf32>
    %cst = arith.constant dense<0.000000e+00> : vector<8x128xf32>
    %5 = tpu.matmul %3, %4, %cst {dimension_numbers = #tpu.dot_dimension_numbers<[1], [0], [0], [1], [0, 0, 1, 1], [], []>} : vector<8x64xf32>, vector<64x128xf32>, vector<8x128xf32> -> vector<8x128xf32>
    %6 = arith.mulf %5, %5 : vector<8x128xf32>
    %c0_4 = arith.constant 0 : index
    %c0_5 = arith.constant 0 : index
    %7 = vector.load %arg4[%c0_4, %c0_5] : memref<128x128xf32, #tpu.memory_space<vmem>>, vector<128x128xf32>
    %cst_6 = arith.constant dense<0.000000e+00> : vector<8x128xf32>
    %8 = tpu.matmul %6, %7, %cst_6 {dimension_numbers = #tpu.dot_dimension_numbers<[1], [0], [0], [1], [0, 0, 1, 1], [], []>} : vector<8x128xf32>, vector<128x128xf32>, vector<8x128xf32> -> vector<8x128xf32>
    %9 = vector.extract_strided_slice %8 {offsets = [0, 0], sizes = [8, 8], strides = [1, 1]} : vector<8x128xf32> to vector<8x8xf32>
    %c0_7 = arith.constant 0 : index
    %c0_8 = arith.constant 0 : index
    %10 = vector.load %arg5[%c0_7, %c0_8] : memref<8x8xf32, #tpu.memory_space<vmem>>, vector<8x8xf32>
    %11 = arith.subf %9, %10 : vector<8x8xf32>
    %12 = math.absf %11 : vector<8x8xf32>
    %13 = vector.shape_cast %12 : vector<8x8xf32> to vector<1x8x8xf32>
    %cst_9 = arith.constant dense<0.000000e+00> : vector<1xf32>
    %14 = vector.multi_reduction <add>, %13, %cst_9 [1, 2] : vector<1x8x8xf32> to vector<1xf32>
    %15 = vector.shape_cast %14 : vector<1xf32> to vector<1x1x1xf32>
    %16 = vector.extract %15[0, 0, 0] : f32 from vector<1x1x1xf32>
    %c0_10 = arith.constant 0 : index
    %c0_11 = arith.constant 0 : index
    %17 = vector.load %arg6[%c0_10, %c0_11] : memref<1x128xf32, #tpu.memory_space<vmem>>, vector<1x128xf32>
    %18 = vector.broadcast %16 : f32 to vector<1x128xf32>
    %19 = arith.addf %17, %18 : vector<1x128xf32>
    %c0_12 = arith.constant 0 : index
    %c0_13 = arith.constant 0 : index
    %20 = vector.load %arg6[%c0_12, %c0_13] : memref<1x128xf32, #tpu.memory_space<vmem>>, vector<1x128xf32>
    tpu.vector_store %arg6[%c0_12, %c0_13], %19 {strides = array<i32>} : memref<1x128xf32, #tpu.memory_space<vmem>>, vector<1x128xf32>,
    return
  }
  func.func @transform_0(%arg0: i32, %arg1: i32) -> (i32, i32) {
    %c1_i32 = arith.constant 1 : i32
    %0 = arith.muli %arg0, %c1_i32 : i32
    %1 = arith.addi %0, %arg1 : i32
    %c0_i32 = arith.constant 0 : i32
    %c0_i32_0 = arith.constant 0 : i32
    return %1, %c0_i32 : i32, i32
  }
  func.func @transform_1(%arg0: i32, %arg1: i32) -> (i32, i32) {
    %c0_i32 = arith.constant 0 : i32
    %c0_i32_0 = arith.constant 0 : i32
    %c0_i32_1 = arith.constant 0 : i32
    return %c0_i32, %c0_i32_0 : i32, i32
  }
  func.func @transform_2(%arg0: i32, %arg1: i32) -> (i32, i32) {
    %c0_i32 = arith.constant 0 : i32
    %c0_i32_0 = arith.constant 0 : i32
    %c0_i32_1 = arith.constant 0 : i32
    return %c0_i32, %c0_i32_0 : i32, i32
  }
  func.func @transform_3(%arg0: i32, %arg1: i32) -> (i32, i32) {
    %c1_i32 = arith.constant 1 : i32
    %0 = arith.muli %arg0, %c1_i32 : i32
    %1 = arith.addi %0, %arg1 : i32
    %c0_i32 = arith.constant 0 : i32
    %c0_i32_0 = arith.constant 0 : i32
    return %1, %c0_i32 : i32, i32
  }
  func.func @transform_4(%arg0: i32, %arg1: i32) -> (i32, i32) {
    %c0_i32 = arith.constant 0 : i32
    %c0_i32_0 = arith.constant 0 : i32
    return %c0_i32, %arg0 : i32, i32
  }
}

</mosaic_0001>

<bundles_post_ra>
// kernel: tpu_custom_call.1
= control target key start
LH: loop header
LB: loop body
LE: loop exit
PB: predicated region body
PF: predicated region fallthrough
CT: control target
= control target key end

     0   :  { %9 = vsyncpa [#allocation3], 0  ;;  %s1178_s0 = inlined_call_operand.vmem [shape: f32[16,64], index: 0, kind: input, shape index: {}]   ;;  %s1179_s1 = inlined_call_operand.hbm [shape: f32[64,128], index: 1, kind: input, shape index: {}]   ;;  %s1180_s2 = inlined_call_operand.hbm [shape: f32[128,128], index: 2, kind: input, shape index: {}]   ;;  %s1181_s3 = inlined_call_operand.vmem [shape: f32[16,8], index: 3, kind: input, shape index: {}]   ;;  %s1182_s4 = inlined_call_operand.hbm [shape: f32[1,256], index: 4, kind: output, shape index: {}]  }
   0x1   :  { %10 = vsyncpa [#allocation6], 0 }
   0x2   :  { %11 = vsyncpa [#allocation4], 0 }
   0x3   :  { %13 = vsyncpa [#allocation4 + $0x1], 0  ;;  %s959_s15 = smov 0   ;;  %s961_s16 = smov 0  }
   0x4   :  { %s963_s17 = smov 0   ;;  %s965_s18 = smov 0  }
   0x5   :  { %s967_s19 = smov 0   ;;  %s969_s20 = smov 0  }
   0x6 LB: > { %s568_s21 = sadd.s32 4294967295, %s924_s20   ;;  %s569_s22 = sadd.s32 4294967294, %s924_s20   ;;  %s924_s20 = sphi %s969_s20, %s19_s20   ;;  %s920_s19 = sphi %s967_s19, %s1200_s19   ;;  %s916_s18 = sphi %s965_s18, %s1199_s18   ;;  %s912_s17 = sphi %s963_s17, %s1198_s17   ;;  %s908_s16 = sphi %s961_s16, %s1197_s16   ;;  %s904_s15 = sphi %s959_s15, %s1196_s15  }
   0x7   : > { %s31_s23 = sadd.s32 1, %s920_s19  ;;  %s136_s24 = sadd.s32 1, %s912_s17 }
   0x8   : > { %p33_p0 = scmp.ge.s32.totalorder %s31_s23, 2  ;;  %p146_p1 = scmp.ne.s32.totalorder %s912_s17, %s908_s16 }
   0x9   : > { %p147_p2 = scmp.eq.s32.totalorder %s568_s21, 1  ;;  %p152_p3 = scmp.ne.s32.totalorder %s908_s16, %s904_s15 }
   0xa   : > { %s1202_s23 = smov (%p33_p0, %s31_s23), 0  ;;  %p153_p5 = scmp.eq.s32.totalorder %s569_s22, 1 }
   0xb   : > { %p999_p4 = por %p147_p2, %p146_p1  ;;  %s133_s26 = ssub.s32 %s920_s19, %s1202_s23 }
   0xc   : > { %p570_p6 = scmp.ge.s32.totalorder %s924_s20, 1  ;;  %p134_p7 = scmp.eq.s32.totalorder %s133_s26, 0 }
   0xd   : > { %s1187_s25 = scalar_select %p999_p4, 1, 0 }
   0xe   : > { %p1006_p8 = por %p153_p5, %p152_p3  ;;  %p160_p9 = scmp.lt.s32.totalorder %s924_s20, 3 }
   0xf   : > { %s1012_s28 = scalar_select %p134_p7, %s912_s17, %s136_s24  }
  0x10   : > { %s1188_s27 = scalar_select %p1006_p8, 1, 0 }
  0x11   : > { %p1014_p10 = pnand %p570_p6, %p160_p9  ;;  %p1018_p11 = scmp.eq.s32.totalorder %s568_s21, 0 }
  0x12   : > { %s926_s5 = smov [#allocation2]   ;;  %s927_s8 = smov [#allocation5]  }
  0x13   : > { %s1189_s29 = scalar_select %p1014_p10, 1, 0 }
  0x14   : > { %s1190_s30 = scalar_select %p1018_p11, 1, 0 }
  0x15   : > { %p711_p12 = pneg %p1014_p10  ;;  %s172_s6 = sshll.u32 %s926_s5, 4  ;;  %s173_s6 = int_to_ptr.vmem [resolvable:$true] %s172_s6 }
  0x16   : > { %s185_s9 = sshll.u32 %s927_s8, 4  ;;  %s782_s12 = scalar_lea.hbm %s1179_s1, 1024  ;;  %s1030_s9 = int_to_ptr.vmem [resolvable:$true] %s185_s9 }
  0x17   : > { %p1026_p13 = pnand %p1018_p11, %p711_p12  ;;  %p783_p0 = scmp.ne.s32.totalorder %s1179_s1, %s782_s12 }
  0x18   : > { %p789_p5 = scmp.lt.u32.totalorder %s782_s12, %s1179_s1 }
  0x19   : > { %p784_p1 = pneg %p1026_p13 }
  0x1b   : > { %p785_p2 = pnand %p784_p1, %p783_p0 }
  0x1d   : > { %p786_p3 = pneg %p785_p2 }
  0x1f   : > { %p791_p6 = pnand %p789_p5, %p786_p3 }
  0x21   : > { %794 = shalt.err (!%p791_p6)
}
  0x22   : > { %s795_s24 = scalar_lea.vmem %s173_s6, 1024  ;;  %p803_p8 = scmp.lt.s32.totalorder %s173_s6, %s173_s6 }
  0x23   : > { %p796_p7 = scmp.ne.s32.totalorder %s173_s6, %s795_s24  ;;  %p804_p4 = scmp.lt.s32.totalorder %s795_s24, %s795_s24 }
  0x25   : > { %p798_p9 = pnand %p796_p7, %p784_p1  ;;  %p805_p11 = por %p804_p4, %p803_p8 }
  0x27   : > { %p799_p12 = pneg %p798_p9 }
  0x29   : > { %p806_p10 = pnand %p805_p11, %p799_p12 }
  0x2b   : > { %809 = shalt.err (!%p806_p10)
}
  0x2c   : > { %s928_s26 = smov 128   ;;  %s929_s5 = smov 8  }
  0x2d   : > { %714 = dma.hbm_to_vmem [thread:$0]  (!%p1026_p13), %s1179_s1, 1024, %s173_s6, [#allocation3], %s928_s26, %s928_s26, %s929_s5  }
  0x2e   : > { %s810_s13 = scalar_lea.hbm %s1180_s2, 2048 }
  0x2f   : > { %p811_p0 = scmp.ne.s32.totalorder %s1180_s2, %s810_s13  ;;  %p817_p10 = scmp.lt.u32.totalorder %s810_s13, %s1180_s2 }
  0x31   : > { %p813_p4 = pnand %p811_p0, %p784_p1 }
  0x33   : > { %p814_p8 = pneg %p813_p4 }
  0x35   : > { %p819_p11 = pnand %p817_p10, %p814_p8 }
  0x37   : > { %822 = shalt.err (!%p819_p11)
}
  0x38   : > { %s823_s6 = scalar_lea.vmem %s1030_s9, 2048  ;;  %p831_p6 = scmp.lt.s32.totalorder %s1030_s9, %s1030_s9 }
  0x39   : > { %p824_p2 = scmp.ne.s32.totalorder %s1030_s9, %s823_s6  ;;  %p832_p7 = scmp.lt.s32.totalorder %s823_s6, %s823_s6 }
  0x3b   : > { %p826_p3 = pnand %p824_p2, %p784_p1  ;;  %p833_p9 = por %p832_p7, %p831_p6 }
  0x3d   : > { %p827_p5 = pneg %p826_p3 }
  0x3f   : > { %p834_p12 = pnand %p833_p9, %p827_p5 }
  0x41   : > { %837 = shalt.err (!%p834_p12)
}
  0x42   : > { %717 = dma.hbm_to_vmem [thread:$0]  (!%p1026_p13), %s1180_s2, 2048, %s1030_s9, [#allocation6], %s928_s26, %s928_s26, %s929_s5  }
  0x43   : > { %p1192_p0 = scmp.ne.s32.totalorder %s1189_s29, 0 }
  0x44   : > { %p1193_p4 = scmp.ne.s32.totalorder (!%p1192_p0), %s1190_s30, 0 }
  0x45   : > { %219 = sbr.rel (%p1192_p0) target bundleno = 750 (0x2ee), region = 36 }
  0x4c   : > { %891 = dma.done.wait (%p1193_p4), [#allocation3], 1024  }
  0x4d   : > { %893 = vsyncadd (%p1193_p4), [#allocation3], 4294966272 }
  0x4e   : > { %895 = dma.done.wait (%p1193_p4), [#allocation6], 2048  }
  0x4f   : > { %897 = vsyncadd (%p1193_p4), [#allocation6], 4294965248  ;;  %s251_s7 = sand.u32 1, %s908_s16   ;;  %v930_v0 = vmov 0.0|0.0   ;;  %vm931_vm0 = vmmov 0   ;;  %v932_v1 = vmov 0.0  }
  0x50   : > { %663 = vmatprep.subr.bf16.mxu0 %v930_v0  ;;  %625 = vmatprep.mubr.msk.f32.mxu0 %vm931_vm0, %v932_v1  ;;  %s1093_s29 = scalar_lea.vmem [#allocation7], %s251_s7  ;;  %v271_v2 = vld [vmem:[#allocation2] sm:$0xff]  ;;  %v272_v3 = vld [vmem:[#allocation2 + $0x8] sm:$0xff]  ;;  %v273_v4 = vld [vmem:[#allocation2 + $0x10] sm:$0xff]  ;;  %p254_p13 = scmp.lt.s32.totalorder %s916_s18, 1  ;;  %vm279_vm1 = vcmask 523264  }
  0x51   : > { %269 = vst [vmem:[%s1093_s29] sm:$0x1] %v932_v1  ;;  %675 = vmatprep.subr.bf16.mxu1 %v930_v0  ;;  %660 = vmatprep.mubr.msk.f32.mxu1 %vm931_vm0, %v932_v1  ;;  %v664_v5 = vpack.c.bf16 %v272_v3, %v271_v2  ;;  %v274_v6 = vld [vmem:[#allocation2 + $0x18] sm:$0xff]  ;;  %v354_v8 = vld [vmem:[#allocation5] sm:$0xff]  ;;  %v355_v9 = vld [vmem:[#allocation5 + $0x8] sm:$0xff]  ;;  %vm443_vm2 = vcmask 64512   ;;  %s580_s21 = sshll.u32 %s916_s18, 4 }
  0x52   : > { %v667_v7 = vpack.c.bf16 %v274_v6, %v273_v4  ;;  %v356_v10 = vld [vmem:[#allocation5 + $0x10] sm:$0xff]  ;;  %v275_v11 = vld [vmem:[#allocation2 + $0x20] sm:$0xff]  ;;  %v276_v12 = vld [vmem:[#allocation2 + $0x28] sm:$0xff]  ;;  %v676_v13 = vpack.c.bf16 %v355_v9, %v354_v8  ;;  %s1100_s30 = scalar_select %p254_p13, %s916_s18, 1 }
  0x53   : > { %665 = vmatpush3.bf16.msra.mxu0 %v664_v5  ;;  %v357_v14 = vld [vmem:[#allocation5 + $0x18] sm:$0xff]  ;;  %v670_v16 = vpack.c.bf16 %v276_v12, %v275_v11  ;;  %v358_v17 = vld [vmem:[#allocation5 + $0x20] sm:$0xff]  ;;  %v359_v18 = vld [vmem:[#allocation5 + $0x28] sm:$0xff]  ;;  %s471_s22 = sshll.u32 %s1093_s29, 4  ;;  %s1128_s10 = scalar_lea.hbm %s1182_s4, %s580_s21  ;;  %s1130_s22 = int_to_ptr.vmem [resolvable:$true] %s471_s22 }
  0x54   : > { %666 = vmatprep.subr.bf16.mxu0 %v930_v0  ;;  %677 = vmatpush3.bf16.msra.mxu1 %v676_v13  ;;  %v679_v15 = vpack.c.bf16 %v357_v14, %v356_v10  ;;  %v277_v19 = vld [vmem:[#allocation2 + $0x30] sm:$0xff]  ;;  %v278_v20 = vld [vmem:[#allocation2 + $0x38] sm:$0xff]  ;;  %s577_s9 = sshll.u32 %s1100_s30, 3  ;;  %v682_v21 = vpack.c.bf16 %v359_v18, %v358_v17  ;;  %v362_v27 = vld [vmem:[#allocation5 + $0x40] sm:$0xff]  ;;  %s459_s30 = scalar_lea.sflag [#allocation4], %s251_s7 }
  0x55   : > { %678 = vmatprep.subr.bf16.mxu1 %v930_v0  ;;  %v673_v22 = vpack.c.bf16 %v278_v20, %v277_v19  ;;  %v360_v23 = vld [vmem:[#allocation5 + $0x30] sm:$0xff]  ;;  %v361_v24 = vld [vmem:[#allocation5 + $0x38] sm:$0xff]  ;;  %s257_s11 = scalar_lea.vmem %s1178_s0, %s577_s9  ;;  %v363_v28 = vld [vmem:[#allocation5 + $0x48] sm:$0xff]  ;;  %s263_s14 = scalar_lea.vmem %s1181_s3, %s577_s9 }
  0x56   : > { %v685_v25 = vpack.c.bf16 %v361_v24, %v360_v23  ;;  %v270_v26 = vld [vmem:[%s257_s11] sm:$0xff]  ;;  %v688_v29 = vpack.c.bf16 %v363_v28, %v362_v27  ;;  %v364_v30 = vld [vmem:[#allocation5 + $0x50] sm:$0xff]  ;;  %v365_v31 = vld [vmem:[#allocation5 + $0x58] sm:$0xff]  ;;  %s838_s9 = scalar_lea.vmem %s1130_s22, 16  ;;  %p1194_p8 = scmp.ne.s32.totalorder %s1187_s25, 0 }
  0x57   : > { %668 = vmatpush3.bf16.msra.mxu0 %v667_v7  ;;  %v691_v32 = vpack.c.bf16 %v365_v31, %v364_v30  ;;  %v366_v33 = vld [vmem:[#allocation5 + $0x60] sm:$0xff]  ;;  %v367_v34 = vld [vmem:[#allocation5 + $0x68] sm:$0xff]  ;;  %v368_v36 = vld [vmem:[#allocation5 + $0x70] sm:$0xff]  ;;  %p839_p1 = scmp.ne.s32.totalorder %s1130_s22, %s838_s9  ;;  %s933_s18 = smov [#allocation7]  }
  0x58   : > { %669 = vmatprep.subr.bf16.mxu0 %v930_v0  ;;  %680 = vmatpush3.bf16.msra.mxu1 %v679_v15  ;;  %v694_v35 = vpack.c.bf16 %v367_v34, %v366_v33  ;;  %v369_v37 = vld [vmem:[#allocation5 + $0x78] sm:$0xff]  ;;  %v440_v42 = vld [vmem:[%s263_s14] sm:$0xff]  ;;  %s842_s26 = sshll.u32 %s933_s18, 4  ;;  %s843_s26 = int_to_ptr.vmem [resolvable:$false] %s842_s26 }
  0x59   : > { %681 = vmatprep.subr.bf16.mxu1 %v930_v0  ;;  %v697_v38 = vpack.c.bf16 %v369_v37, %v368_v36  ;;  %v454_v55 = vld [vmem:[%s1093_s29] sm:$0x1]  ;;  %p840_p10 = pnand %p839_p1, %p1194_p8  ;;  %s844_s5 = scalar_lea.vmem %s843_s26, 32 }
  0x5a   : > { %p845_p2 = scmp.lt.s32.totalorder %s1130_s22, %s843_s26  ;;  %p846_p3 = scmp.lt.s32.totalorder %s844_s5, %s838_s9 }
  0x5b   : > { %671 = vmatpush3.bf16.msra.mxu0 %v670_v16  ;;  %p841_p11 = pneg %p840_p10 }
  0x5c   : > { %672 = vmatprep.subr.bf16.mxu0 %v930_v0  ;;  %683 = vmatpush3.bf16.msra.mxu1 %v682_v21  ;;  %p847_p5 = por %p846_p3, %p845_p2 }
  0x5d   : > { %684 = vmatprep.subr.bf16.mxu1 %v930_v0 }
  0x5e   : > { %p848_p6 = pnand %p847_p5, %p841_p11 }
  0x5f   : > { %674 = vmatpush3.bf16.msra.mxu0 %v673_v22 }
  0x60   : > { %686 = vmatpush3.bf16.msra.mxu1 %v685_v25 }
  0x61   : > { %687 = vmatprep.subr.bf16.mxu1 %v930_v0 }
  0x62   : > { %626 = vmatmul.mubr.msk.f32.vlgmr.msra.gmra.mrb[0].mxu0 %vm279_vm1, %v270_v26 }
  0x64   : > { %689 = vmatpush3.bf16.msra.mxu1 %v688_v29 }
  0x65   : > { %690 = vmatprep.subr.bf16.mxu1 %v930_v0 }
  0x68   : > { %692 = vmatpush3.bf16.msra.mxu1 %v691_v32 }
  0x69   : > { %693 = vmatprep.subr.bf16.mxu1 %v930_v0 }
  0x6c   : > { %695 = vmatpush3.bf16.msra.mxu1 %v694_v35 }
  0x6d   : > { %696 = vmatprep.subr.bf16.mxu1 %v930_v0 }
  0x70   : > { %698 = vmatpush3.bf16.msra.mxu1 %v697_v38 }
 0x135   : > { %v349_v39 = vpop.f32.mrb[0].mxu0 }
 0x136   : > { %v353_v40 = vmul.f32 %v349_v39, %v349_v39  ;;  %v627_v41 = vpop.f32.mrb[1].mxu0 }
 0x138   : > { %661 = vmatmul.mubr.f32.vlgmr.msra.gmra.mrb[0].mxu1 %v353_v40 }
 0x20b   : > { %v436_v43 = vpop.f32.mrb[0].mxu1 }
 0x20c   : > { %v441_v44 = vsub.f32 %v436_v43, %v440_v42  ;;  %v662_v45 = vpop.f32.mrb[1].mxu1 }
 0x20e   : > { %v442_v46 = vand.u32 2147483647, %v441_v44 }
 0x210   : > { %v444_v47 = vsel %vm443_vm2, %v442_v46, 0.0 }
 0x211   : > { %445 = vadd.xlane.f32.xlu0 %v444_v47 }
 0x29e   : > { %v446_v48 = vpop.xlane.xlu0 %445 }
 0x29f   : > { %v447_v49 = vrot.slane %v446_v48, 4 }
 0x2a1   : > { %v448_v50 = vadd.f32 %v447_v49, %v446_v48 }
 0x2a3   : > { %v449_v51 = vrot.slane %v448_v50, 2 }
 0x2a5   : > { %v450_v52 = vadd.f32 %v449_v51, %v448_v50 }
 0x2a7   : > { %v451_v53 = vrot.slane %v450_v52, 1 }
 0x2a9   : > { %v452_v54 = vadd.f32 %v451_v53, %v450_v52 }
 0x2ab   : > { %699 = vpush %v452_v54 }
 0x2dc   : > { %s700_s24 = spop %699 }
 0x2dd   : > { %v455_v56 = vstv %s700_s24 }
 0x2de   : > { %v456_v57 = vadd.f32 %v455_v56, %v454_v55 }
 0x2e0   : > { %457 = vst [vmem:[%s1093_s29] sm:$0x1] %v456_v57 }
 0x2e1   : > { %851 = shalt.err (!%p848_p6)
}
 0x2e2   : > { %s852_s7 = scalar_lea.hbm %s1128_s10, 16  ;;  %s856_s12 = scalar_lea.hbm %s1182_s4, 32 }
 0x2e3   : > { %p853_p7 = scmp.ne.s32.totalorder %s1128_s10, %s852_s7  ;;  %p857_p0 = scmp.lt.u32.totalorder %s1128_s10, %s1182_s4 }
 0x2e4   : > { %p858_p4 = scmp.lt.u32.totalorder %s856_s12, %s852_s7  ;;  %p860_p1 = scmp.lt.u32.totalorder %s852_s7, %s1128_s10 }
 0x2e5   : > { %p854_p9 = pnand %p853_p7, %p1194_p8 }
 0x2e6   : > { %p859_p13 = por %p858_p4, %p857_p0 }
 0x2e7   : > { %p855_p12 = pneg %p854_p9 }
 0x2e8   : > { %p861_p10 = por %p860_p1, %p859_p13 }
 0x2ea   : > { %p862_p11 = pnand %p861_p10, %p855_p12 }
 0x2ec   : > { %865 = shalt.err (!%p862_p11)
}
 0x2ed   : > { %709 = dma.vmem_to_hbm [thread:$0]  (%p1194_p8), %s1130_s22, 16, %s1128_s10, %s459_s30  }
 0x2ee PF: > { %p726_p2 = scmp.ge.s32.totalorder %s924_s20, 2  ;;  %s483_s21 = sand.u32 1, %s904_s15  }
 0x2ef   : > { %p1195_p3 = scmp.ne.s32.totalorder %s1188_s27, 0  ;;  %s484_s24 = scalar_lea.sflag [#allocation4], %s483_s21 }
 0x2f1   : > { %p719_p5 = pnand %p726_p2, %p1195_p3 }
 0x2f3   : > { %899 = dma.done.wait (!%p719_p5), %s484_s24, 16  }
 0x2f4   : > { %901 = vsyncadd (!%p719_p5), %s484_s24, 4294967280  ;;  %s19_s20 = sadd.s32 1, %s924_s20   ;;  %s1196_s15 = smov %s908_s16 }
 0x2f5   : > { %p16_p6 = scmp.ge.s32.totalorder %s19_s20, 4   ;;  %s1197_s16 = smov %s912_s17 }
 0x2f6   : > { %s1198_s17 = smov %s1012_s28  ;;  %s1199_s18 = smov %s920_s19 }
 0x2f7   : > { %s1200_s19 = smov %s1202_s23  ;;  %18 = sbr.rel (!%p16_p6) target bundleno = 6 (0x6), region = 87 }
 0x2fe   :  { %488 = vsyncpa [#allocation3], 1 }
 0x2ff   :  { %490 = vsyncpa [#allocation3 + $0x1], 1 }
 0x300   :  { %491 = vsyncpa [#allocation6], 1 }
 0x301   :  { %492 = vsyncpa [#allocation4], 1 }
 0x302   :  { %494 = vsyncpa [#allocation4 + $0x1], 1 }

</bundles_post_ra>
